<compile_context>
chip_gen: v7x
topology: tpu7x:2x2x1
jax: 0.10.0
libtpu: 0.0.40
codegen_flags: <defaults>
</compile_context>

<pallas_src>
import functools

import jax
import jax.numpy as jnp
from jax import lax
from jax.experimental import pallas as pl
from jax.experimental.pallas import tpu as pltpu

# contract dim 1 of lhs with dim 1 of rhs, i.e. A @ B.T (MXU-native trans_b;
# verified Mosaic does not insert an XLU transpose for this form).
_NT = (((1,), (1,)), ((), ()))


def _cast(x, dtype):
    return x if x.dtype == dtype else x.astype(dtype)


def _contrastive_kernel(inv_temp, mxu_dtype, tm, tn,
                        img_ref, txt_ref, wi_ref, bi_ref, wt_ref, bt_ref,
                        out_ref, ip_sc, m_sc, l_sc, d_sc):
    """One (row-block i, col-block j) step of the online-logsumexp sweep."""
    i = pl.program_id(0)
    j = pl.program_id(1)
    eps2 = 1e-12 * 1e-12  # F.normalize eps, squared (applied to sum of squares)

    # ---- j == 0: project + normalize this image row block once, init stats.
    @pl.when(j == 0)
    def _():
        ip = lax.dot_general(_cast(img_ref[...], mxu_dtype),
                             _cast(wi_ref[...], mxu_dtype),
                             dimension_numbers=_NT,
                             preferred_element_type=jnp.float32) + bi_ref[...]
        ss = jnp.sum(ip * ip, axis=1, keepdims=True)
        # F.normalize(dim=1) == x * rsqrt(max(sum(x^2), eps^2)); fold 1/T into
        # the image-side scale so logits never need a post-scale.
        ip = ip * (lax.rsqrt(jnp.maximum(ss, eps2)) * inv_temp)
        ip_sc[...] = _cast(ip, ip_sc.dtype)
        m_sc[...] = jnp.full(m_sc.shape, -jnp.inf, jnp.float32)
        l_sc[...] = jnp.zeros(l_sc.shape, jnp.float32)
        d_sc[...] = jnp.zeros(d_sc.shape, jnp.float32)

    # ---- text projection + normalization for this column block.
    tp = lax.dot_general(_cast(txt_ref[...], mxu_dtype),
                         _cast(wt_ref[...], mxu_dtype),
                         dimension_numbers=_NT,
                         preferred_element_type=jnp.float32) + bt_ref[...]
    ss_t = jnp.sum(tp * tp, axis=1, keepdims=True)
    tp = tp * lax.rsqrt(jnp.maximum(ss_t, eps2))

    # ---- similarity tile (TM, TN); temperature already folded into ip.
    s = lax.dot_general(ip_sc[...], _cast(tp, ip_sc.dtype),
                        dimension_numbers=_NT,
                        preferred_element_type=jnp.float32)

    # Diagonal logits[r, r] extracted from the same MXU tile used for lse.
    row_ids = i * tm + lax.broadcasted_iota(jnp.int32, (tm, tn), 0)
    col_ids = j * tn + lax.broadcasted_iota(jnp.int32, (tm, tn), 1)
    d_sc[...] += jnp.sum(jnp.where(row_ids == col_ids, s, 0.0),
                         axis=1, keepdims=True)

    # Online logsumexp update.
    m_prev = m_sc[...]
    m_new = jnp.maximum(m_prev, jnp.max(s, axis=1, keepdims=True))
    l_sc[...] = (jnp.exp(m_prev - m_new) * l_sc[...]
                 + jnp.sum(jnp.exp(s - m_new), axis=1, keepdims=True))
    m_sc[...] = m_new

    # ---- last column block: per-row loss = logsumexp_i - logits[i, i].
    @pl.when(j == pl.num_programs(1) - 1)
    def _():
        out_ref[...] = m_sc[...] + jnp.log(l_sc[...]) - d_sc[...]


def _pick_block(n, cap):
    for cand in (cap, 512, 256, 128, 64, 32, 16, 8):
        if cand <= cap and cand <= n and n % cand == 0:
            return cand
    return n  # full-extent block (always legal)


def contrastive_loss(image_embeddings, text_embeddings, params,
                     temperature=0.07, *, mxu_dtype=jnp.bfloat16,
                     block_rows=256, block_cols=512):
    """params: img_w (P, Di), img_b (P,), txt_w (P, Dt), txt_b (P,).

    mxu_dtype: operand dtype for the three matmuls (accumulation is always
    f32). bf16 is the production setting (v5e/v6e/v7x MXUs are bf16-native);
    use jnp.float32 for bit-accurate comparison against an f32 reference.
    """
    B, Ki = image_embeddings.shape
    _, Kt = text_embeddings.shape
    P = params["img_w"].shape[0]

    # No wrapper-side lane padding: Mosaic pads the (unaligned) feature lanes
    # in VMEM; padding in HBM only inflates DMA traffic.
    img = _cast(image_embeddings, jnp.float32)            # (B, Ki)
    txt = _cast(text_embeddings, jnp.float32)             # (B, Kt)
    wi = _cast(params["img_w"], jnp.float32)              # (P, Ki) as nn.Linear
    wt = _cast(params["txt_w"], jnp.float32)              # (P, Kt)
    bi = _cast(params["img_b"], jnp.float32).reshape(1, P)
    bt = _cast(params["txt_b"], jnp.float32).reshape(1, P)

    tm = _pick_block(B, block_rows)
    tn = _pick_block(B, block_cols)
    grid = (B // tm, B // tn)

    kernel = functools.partial(_contrastive_kernel, float(1.0 / temperature),
                               mxu_dtype, tm, tn)

    flops = int(2 * B * B * P + 2 * B * Ki * P + 2 * B * Kt * P * grid[0])
    transcendentals = int(B * B + 2 * B + B * grid[0])
    bytes_accessed = int(4 * (B * Ki + B * Kt * grid[0]
                              + P * (Ki + Kt) + 2 * P + B))

    per_row = pl.pallas_call(
        kernel,
        out_shape=jax.ShapeDtypeStruct((B, 1), jnp.float32),
        grid_spec=pltpu.PrefetchScalarGridSpec(
            num_scalar_prefetch=0,
            grid=grid,
            in_specs=[
                pl.BlockSpec((tm, Ki), lambda i, j: (i, 0)),   # image rows
                pl.BlockSpec((tn, Kt), lambda i, j: (j, 0)),   # text cols
                pl.BlockSpec((P, Ki), lambda i, j: (0, 0)),    # wi resident
                pl.BlockSpec((1, P), lambda i, j: (0, 0)),     # bi resident
                pl.BlockSpec((P, Kt), lambda i, j: (0, 0)),    # wt resident
                pl.BlockSpec((1, P), lambda i, j: (0, 0)),     # bt resident
            ],
            out_specs=pl.BlockSpec((tm, 1), lambda i, j: (i, 0)),
            scratch_shapes=[
                pltpu.VMEM((tm, P), mxu_dtype),     # normalized, 1/T-scaled ip
                pltpu.VMEM((tm, 1), jnp.float32),   # running max
                pltpu.VMEM((tm, 1), jnp.float32),   # running exp-sum
                pltpu.VMEM((tm, 1), jnp.float32),   # diagonal logits
            ],
        ),
        compiler_params=pltpu.CompilerParams(
            dimension_semantics=("parallel", "arbitrary"),
            vmem_limit_bytes=32 * 1024 * 1024,      # safe on v5e/v6e/v7x
        ),
        cost_estimate=pl.CostEstimate(flops=flops,
                                      transcendentals=transcendentals,
                                      bytes_accessed=bytes_accessed),
    )(img, txt, wi, bi, wt, bt)

    # mean_i(logsumexp_i - logits[i, i]); tiny (B,) reduction in the wrapper
    # (kept outside the kernel so the parallel row-block axis stays race-free).
    return jnp.mean(per_row[:, 0])


def _reference(image_embeddings, text_embeddings, params, temperature=0.07):
    ip = image_embeddings @ params["img_w"].T + params["img_b"]
    tp = text_embeddings @ params["txt_w"].T + params["txt_b"]
    ip = ip / jnp.maximum(jnp.linalg.norm(ip, axis=1, keepdims=True), 1e-12)
    tp = tp / jnp.maximum(jnp.linalg.norm(tp, axis=1, keepdims=True), 1e-12)
    logits = ip @ tp.T / temperature
    labels = jnp.arange(logits.shape[0])
    logp = jax.nn.log_softmax(logits, axis=1)
    return -jnp.mean(logp[jnp.arange(logits.shape[0]), labels])


if __name__ == "__main__":
    # NOTE: B=8 is a correctness shape, not a performance-representative one
    # (MXU row utilization 8/256; fixed per-step overhead dominates).  Tune
    # block_rows/block_cols at production B (>=256, multiples of 256 on
    # v6e/v7x, 128 on v5e).
    B = 8
    image_dim = 32
    text_dim = 48
    projection_dim = 128
    temperature = 0.07

    key = jax.random.PRNGKey(0)
    k1, k2, k3, k4, k5, k6 = jax.random.split(key, 6)

    bound_i = 1.0 / jnp.sqrt(image_dim)
    bound_t = 1.0 / jnp.sqrt(text_dim)
    params = {
        "img_w": jax.random.uniform(k1, (projection_dim, image_dim),
                                    minval=-bound_i, maxval=bound_i,
                                    dtype=jnp.float32),
        "img_b": jax.random.uniform(k2, (projection_dim,),
                                    minval=-bound_i, maxval=bound_i,
                                    dtype=jnp.float32),
        "txt_w": jax.random.uniform(k3, (projection_dim, text_dim),
                                    minval=-bound_t, maxval=bound_t,
                                    dtype=jnp.float32),
        "txt_b": jax.random.uniform(k4, (projection_dim,),
                                    minval=-bound_t, maxval=bound_t,
                                    dtype=jnp.float32),
    }
    image_embeddings = jax.random.normal(k5, (B, image_dim), dtype=jnp.float32)
    text_embeddings = jax.random.normal(k6, (B, text_dim), dtype=jnp.float32)

    ref = _reference(image_embeddings, text_embeddings, params, temperature)

    # f32 MXU operands: exact path, tight tolerance against the f32 reference.
    loss_f32 = jax.block_until_ready(
        contrastive_loss(image_embeddings, text_embeddings, params,
                         temperature, mxu_dtype=jnp.float32))
    assert jnp.allclose(loss_f32, ref, atol=1e-4, rtol=1e-4), (loss_f32, ref)

    # bf16 MXU operands (f32 accumulation): production path, looser tolerance
    # (values are unit-normalized, so the error stays small).
    loss_bf16 = jax.block_until_ready(
        contrastive_loss(image_embeddings, text_embeddings, params,
                         temperature, mxu_dtype=jnp.bfloat16))
    assert jnp.allclose(loss_bf16, ref, atol=5e-2, rtol=5e-2), (loss_bf16, ref)

    print("KERNEL_OK")
</pallas_src>

<mosaic_0001>
module attributes {stable_mosaic.version = 11 : i64} {
  func.func @_contrastive_kernel(%arg0: i32, %arg1: i32, %arg2: memref<8x32xf32, #tpu.memory_space<vmem>>, %arg3: memref<8x48xf32, #tpu.memory_space<vmem>>, %arg4: memref<128x32xf32, #tpu.memory_space<vmem>>, %arg5: memref<1x128xf32, #tpu.memory_space<vmem>>, %arg6: memref<128x48xf32, #tpu.memory_space<vmem>>, %arg7: memref<1x128xf32, #tpu.memory_space<vmem>>, %arg8: memref<8x1xf32, #tpu.memory_space<vmem>>, %arg9: memref<8x128xf32, #tpu.memory_space<vmem>>, %arg10: memref<8x1xf32, #tpu.memory_space<vmem>>, %arg11: memref<8x1xf32, #tpu.memory_space<vmem>>, %arg12: memref<8x1xf32, #tpu.memory_space<vmem>>) attributes {dimension_semantics = [#tpu.dimension_semantics<parallel>, #tpu.dimension_semantics<arbitrary>], iteration_bounds = array<i64: 1, 1>, scalar_prefetch = 0 : i64, scratch_operands = 4 : i64, tpu.core_type = #tpu.core_type<tc>, window_params = [{transform_indices = @transform_0, window_bounds = array<i64: 8, 32>}, {transform_indices = @transform_1, window_bounds = array<i64: 8, 48>}, {pipeline_mode = #tpu.pipeline_mode<synchronous>, transform_indices = @transform_2, window_bounds = array<i64: 128, 32>}, {pipeline_mode = #tpu.pipeline_mode<synchronous>, transform_indices = @transform_3, window_bounds = array<i64: 1, 128>}, {pipeline_mode = #tpu.pipeline_mode<synchronous>, transform_indices = @transform_4, window_bounds = array<i64: 128, 48>}, {pipeline_mode = #tpu.pipeline_mode<synchronous>, transform_indices = @transform_5, window_bounds = array<i64: 1, 128>}, {transform_indices = @transform_6, window_bounds = array<i64: 8, 1>}]} {
    %c0_i32 = arith.constant 0 : i32
    %0 = arith.cmpi eq, %arg1, %c0_i32 : i32
    %1 = arith.extui %0 : i1 to i32
    %c0_i32_0 = arith.constant 0 : i32
    %2 = arith.cmpi ne, %1, %c0_i32_0 : i32
    scf.if %2 {
      %c0_30 = arith.constant 0 : index
      %c0_31 = arith.constant 0 : index
      %54 = vector.load %arg2[%c0_30, %c0_31] : memref<8x32xf32, #tpu.memory_space<vmem>>, vector<8x32xf32>
      %c0_32 = arith.constant 0 : index
      %c0_33 = arith.constant 0 : index
      %55 = vector.load %arg4[%c0_32, %c0_33] : memref<128x32xf32, #tpu.memory_space<vmem>>, vector<128x32xf32>
      %cst_34 = arith.constant dense<0.000000e+00> : vector<8x128xf32>
      %56 = tpu.matmul %54, %55, %cst_34 {dimension_numbers = #tpu.dot_dimension_numbers<[1], [1], [0], [0], [0, 0, 1, 0], [], []>} : vector<8x32xf32>, vector<128x32xf32>, vector<8x128xf32> -> vector<8x128xf32>
      %c0_35 = arith.constant 0 : index
      %c0_36 = arith.constant 0 : index
      %57 = vector.load %arg5[%c0_35, %c0_36] : memref<1x128xf32, #tpu.memory_space<vmem>>, vector<1x128xf32>
      %58 = vector.broadcast %57 : vector<1x128xf32> to vector<8x128xf32>
      %59 = arith.addf %56, %58 : vector<8x128xf32>
      %60 = arith.mulf %59, %59 : vector<8x128xf32>
      %cst_37 = arith.constant dense<0.000000e+00> : vector<8xf32>
      %61 = vector.multi_reduction <add>, %60, %cst_37 [1] : vector<8x128xf32> to vector<8xf32>
      %62 = vector.shape_cast %61 : vector<8xf32> to vector<8x1xf32>
      %cst_38 = arith.constant 1.000000e-24 : f32
      %63 = vector.broadcast %cst_38 : f32 to vector<8x1xf32>
      %64 = arith.maximumf %62, %63 : vector<8x1xf32>
      %65 = math.rsqrt %64 : vector<8x1xf32>
      %cst_39 = arith.constant 14.2857141 : f32
      %66 = vector.broadcast %cst_39 : f32 to vector<8x1xf32>
      %67 = arith.mulf %65, %66 : vector<8x1xf32>
      %68 = vector.broadcast %67 : vector<8x1xf32> to vector<8x128xf32>
      %69 = arith.mulf %59, %68 : vector<8x128xf32>
      %c0_40 = arith.constant 0 : index
      %c0_41 = arith.constant 0 : index
      %70 = vector.load %arg9[%c0_40, %c0_41] : memref<8x128xf32, #tpu.memory_space<vmem>>, vector<8x128xf32>
      tpu.vector_store %arg9[%c0_40, %c0_41], %69 {strides = array<i32>} : memref<8x128xf32, #tpu.memory_space<vmem>>, vector<8x128xf32>,
      %cst_42 = arith.constant 0xFF800000 : f32
      %71 = vector.broadcast %cst_42 : f32 to vector<8x1xf32>
      %c0_43 = arith.constant 0 : index
      %c0_44 = arith.constant 0 : index
      %72 = vector.load %arg10[%c0_43, %c0_44] : memref<8x1xf32, #tpu.memory_space<vmem>>, vector<8x1xf32>
      tpu.vector_store %arg10[%c0_43, %c0_44], %71 {strides = array<i32>} : memref<8x1xf32, #tpu.memory_space<vmem>>, vector<8x1xf32>,
      %cst_45 = arith.constant 0.000000e+00 : f32
      %73 = vector.broadcast %cst_45 : f32 to vector<8x1xf32>
      %c0_46 = arith.constant 0 : index
      %c0_47 = arith.constant 0 : index
      %74 = vector.load %arg11[%c0_46, %c0_47] : memref<8x1xf32, #tpu.memory_space<vmem>>, vector<8x1xf32>
      tpu.vector_store %arg11[%c0_46, %c0_47], %73 {strides = array<i32>} : memref<8x1xf32, #tpu.memory_space<vmem>>, vector<8x1xf32>,
      %cst_48 = arith.constant 0.000000e+00 : f32
      %75 = vector.broadcast %cst_48 : f32 to vector<8x1xf32>
      %c0_49 = arith.constant 0 : index
      %c0_50 = arith.constant 0 : index
      %76 = vector.load %arg12[%c0_49, %c0_50] : memref<8x1xf32, #tpu.memory_space<vmem>>, vector<8x1xf32>
      tpu.vector_store %arg12[%c0_49, %c0_50], %75 {strides = array<i32>} : memref<8x1xf32, #tpu.memory_space<vmem>>, vector<8x1xf32>,
    } else {
    }
    %c0 = arith.constant 0 : index
    %c0_1 = arith.constant 0 : index
    %3 = vector.load %arg3[%c0, %c0_1] : memref<8x48xf32, #tpu.memory_space<vmem>>, vector<8x48xf32>
    %c0_2 = arith.constant 0 : index
    %c0_3 = arith.constant 0 : index
    %4 = vector.load %arg6[%c0_2, %c0_3] : memref<128x48xf32, #tpu.memory_space<vmem>>, vector<128x48xf32>
    %cst = arith.constant dense<0.000000e+00> : vector<8x128xf32>
    %5 = tpu.matmul %3, %4, %cst {dimension_numbers = #tpu.dot_dimension_numbers<[1], [1], [0], [0], [0, 0, 1, 0], [], []>} : vector<8x48xf32>, vector<128x48xf32>, vector<8x128xf32> -> vector<8x128xf32>
    %c0_4 = arith.constant 0 : index
    %c0_5 = arith.constant 0 : index
    %6 = vector.load %arg7[%c0_4, %c0_5] : memref<1x128xf32, #tpu.memory_space<vmem>>, vector<1x128xf32>
    %7 = vector.broadcast %6 : vector<1x128xf32> to vector<8x128xf32>
    %8 = arith.addf %5, %7 : vector<8x128xf32>
    %9 = arith.mulf %8, %8 : vector<8x128xf32>
    %cst_6 = arith.constant dense<0.000000e+00> : vector<8xf32>
    %10 = vector.multi_reduction <add>, %9, %cst_6 [1] : vector<8x128xf32> to vector<8xf32>
    %11 = vector.shape_cast %10 : vector<8xf32> to vector<8x1xf32>
    %cst_7 = arith.constant 1.000000e-24 : f32
    %12 = vector.broadcast %cst_7 : f32 to vector<8x1xf32>
    %13 = arith.maximumf %11, %12 : vector<8x1xf32>
    %14 = math.rsqrt %13 : vector<8x1xf32>
    %15 = vector.broadcast %14 : vector<8x1xf32> to vector<8x128xf32>
    %16 = arith.mulf %8, %15 : vector<8x128xf32>
    %c0_8 = arith.constant 0 : index
    %c0_9 = arith.constant 0 : index
    %17 = vector.load %arg9[%c0_8, %c0_9] : memref<8x128xf32, #tpu.memory_space<vmem>>, vector<8x128xf32>
    %cst_10 = arith.constant dense<0.000000e+00> : vector<8x8xf32>
    %18 = tpu.matmul %17, %16, %cst_10 {dimension_numbers = #tpu.dot_dimension_numbers<[1], [1], [0], [0], [0, 0, 1, 0], [], []>} : vector<8x128xf32>, vector<8x128xf32>, vector<8x8xf32> -> vector<8x8xf32>
    %c8_i32 = arith.constant 8 : i32
    %19 = arith.muli %arg0, %c8_i32 : i32
    %20 = tpu.iota {dimensions = array<i32: 0>} : vector<8x8xi32>
    %21 = vector.broadcast %19 : i32 to vector<8x8xi32>
    %22 = arith.addi %21, %20 : vector<8x8xi32>
    %c8_i32_11 = arith.constant 8 : i32
    %23 = arith.muli %arg1, %c8_i32_11 : i32
    %24 = tpu.iota {dimensions = array<i32: 1>} : vector<8x8xi32>
    %25 = vector.broadcast %23 : i32 to vector<8x8xi32>
    %26 = arith.addi %25, %24 : vector<8x8xi32>
    %c0_12 = arith.constant 0 : index
    %c0_13 = arith.constant 0 : index
    %27 = vector.load %arg12[%c0_12, %c0_13] : memref<8x1xf32, #tpu.memory_space<vmem>>, vector<8x1xf32>
    %28 = arith.cmpi eq, %22, %26 : vector<8x8xi32>
    %cst_14 = arith.constant 0.000000e+00 : f32
    %29 = vector.broadcast %cst_14 : f32 to vector<8x8xf32>
    %30 = arith.select %28, %18, %29 : vector<8x8xi1>, vector<8x8xf32>
    %cst_15 = arith.constant dense<0.000000e+00> : vector<8xf32>
    %31 = vector.multi_reduction <add>, %30, %cst_15 [1] : vector<8x8xf32> to vector<8xf32>
    %32 = vector.shape_cast %31 : vector<8xf32> to vector<8x1xf32>
    %33 = arith.addf %27, %32 : vector<8x1xf32>
    %c0_16 = arith.constant 0 : index
    %c0_17 = arith.constant 0 : index
    %34 = vector.load %arg12[%c0_16, %c0_17] : memref<8x1xf32, #tpu.memory_space<vmem>>, vector<8x1xf32>
    tpu.vector_store %arg12[%c0_16, %c0_17], %33 {strides = array<i32>} : memref<8x1xf32, #tpu.memory_space<vmem>>, vector<8x1xf32>,
    %c0_18 = arith.constant 0 : index
    %c0_19 = arith.constant 0 : index
    %35 = vector.load %arg10[%c0_18, %c0_19] : memref<8x1xf32, #tpu.memory_space<vmem>>, vector<8x1xf32>
    %cst_20 = arith.constant dense<0xFF800000> : vector<8xf32>
    %36 = vector.multi_reduction <maximumf>, %18, %cst_20 [1] : vector<8x8xf32> to vector<8xf32>
    %37 = vector.shape_cast %36 : vector<8xf32> to vector<8x1xf32>
    %38 = arith.maximumf %35, %37 : vector<8x1xf32>
    %39 = arith.subf %35, %38 : vector<8x1xf32>
    %40 = math.exp %39 : vector<8x1xf32>
    %c0_21 = arith.constant 0 : index
    %c0_22 = arith.constant 0 : index
    %41 = vector.load %arg11[%c0_21, %c0_22] : memref<8x1xf32, #tpu.memory_space<vmem>>, vector<8x1xf32>
    %42 = arith.mulf %40, %41 : vector<8x1xf32>
    %43 = vector.broadcast %38 : vector<8x1xf32> to vector<8x8xf32>
    %44 = arith.subf %18, %43 : vector<8x8xf32>
    %45 = math.exp %44 : vector<8x8xf32>
    %cst_23 = arith.constant dense<0.000000e+00> : vector<8xf32>
    %46 = vector.multi_reduction <add>, %45, %cst_23 [1] : vector<8x8xf32> to vector<8xf32>
    %47 = vector.shape_cast %46 : vector<8xf32> to vector<8x1xf32>
    %48 = arith.addf %42, %47 : vector<8x1xf32>
    %c0_24 = arith.constant 0 : index
    %c0_25 = arith.constant 0 : index
    %49 = vector.load %arg11[%c0_24, %c0_25] : memref<8x1xf32, #tpu.memory_space<vmem>>, vector<8x1xf32>
    tpu.vector_store %arg11[%c0_24, %c0_25], %48 {strides = array<i32>} : memref<8x1xf32, #tpu.memory_space<vmem>>, vector<8x1xf32>,
    %c0_26 = arith.constant 0 : index
    %c0_27 = arith.constant 0 : index
    %50 = vector.load %arg10[%c0_26, %c0_27] : memref<8x1xf32, #tpu.memory_space<vmem>>, vector<8x1xf32>
    tpu.vector_store %arg10[%c0_26, %c0_27], %38 {strides = array<i32>} : memref<8x1xf32, #tpu.memory_space<vmem>>, vector<8x1xf32>,
    %c0_i32_28 = arith.constant 0 : i32
    %51 = arith.cmpi eq, %arg1, %c0_i32_28 : i32
    %52 = arith.extui %51 : i1 to i32
    %c0_i32_29 = arith.constant 0 : i32
    %53 = arith.cmpi ne, %52, %c0_i32_29 : i32
    scf.if %53 {
      %c0_30 = arith.constant 0 : index
      %c0_31 = arith.constant 0 : index
      %54 = vector.load %arg10[%c0_30, %c0_31] : memref<8x1xf32, #tpu.memory_space<vmem>>, vector<8x1xf32>
      %c0_32 = arith.constant 0 : index
      %c0_33 = arith.constant 0 : index
      %55 = vector.load %arg11[%c0_32, %c0_33] : memref<8x1xf32, #tpu.memory_space<vmem>>, vector<8x1xf32>
      %56 = math.log %55 : vector<8x1xf32>
      %57 = arith.addf %54, %56 : vector<8x1xf32>
      %c0_34 = arith.constant 0 : index
      %c0_35 = arith.constant 0 : index
      %58 = vector.load %arg12[%c0_34, %c0_35] : memref<8x1xf32, #tpu.memory_space<vmem>>, vector<8x1xf32>
      %59 = arith.subf %57, %58 : vector<8x1xf32>
      %c0_36 = arith.constant 0 : index
      %c0_37 = arith.constant 0 : index
      %60 = vector.load %arg8[%c0_36, %c0_37] : memref<8x1xf32, #tpu.memory_space<vmem>>, vector<8x1xf32>
      tpu.vector_store %arg8[%c0_36, %c0_37], %59 {strides = array<i32>} : memref<8x1xf32, #tpu.memory_space<vmem>>, vector<8x1xf32>,
    } else {
    }
    return
  }
  func.func @transform_0(%arg0: i32, %arg1: i32) -> (i32, i32) {
    %c0_i32 = arith.constant 0 : i32
    %c0_i32_0 = arith.constant 0 : i32
    return %arg0, %c0_i32 : i32, i32
  }
  func.func @transform_1(%arg0: i32, %arg1: i32) -> (i32, i32) {
    %c0_i32 = arith.constant 0 : i32
    %c0_i32_0 = arith.constant 0 : i32
    return %arg1, %c0_i32 : i32, i32
  }
  func.func @transform_2(%arg0: i32, %arg1: i32) -> (i32, i32) {
    %c0_i32 = arith.constant 0 : i32
    %c0_i32_0 = arith.constant 0 : i32
    %c0_i32_1 = arith.constant 0 : i32
    return %c0_i32, %c0_i32_0 : i32, i32
  }
  func.func @transform_3(%arg0: i32, %arg1: i32) -> (i32, i32) {
    %c0_i32 = arith.constant 0 : i32
    %c0_i32_0 = arith.constant 0 : i32
    %c0_i32_1 = arith.constant 0 : i32
    return %c0_i32, %c0_i32_0 : i32, i32
  }
  func.func @transform_4(%arg0: i32, %arg1: i32) -> (i32, i32) {
    %c0_i32 = arith.constant 0 : i32
    %c0_i32_0 = arith.constant 0 : i32
    %c0_i32_1 = arith.constant 0 : i32
    return %c0_i32, %c0_i32_0 : i32, i32
  }
  func.func @transform_5(%arg0: i32, %arg1: i32) -> (i32, i32) {
    %c0_i32 = arith.constant 0 : i32
    %c0_i32_0 = arith.constant 0 : i32
    %c0_i32_1 = arith.constant 0 : i32
    return %c0_i32, %c0_i32_0 : i32, i32
  }
  func.func @transform_6(%arg0: i32, %arg1: i32) -> (i32, i32) {
    %c0_i32 = arith.constant 0 : i32
    %c0_i32_0 = arith.constant 0 : i32
    return %arg0, %c0_i32 : i32, i32
  }
}

</mosaic_0001>

<bundles_post_ra>
// kernel: tpu_custom_call.1
= control target key start
LH: loop header
LB: loop body
LE: loop exit
PB: predicated region body
PF: predicated region fallthrough
CT: control target
= control target key end

     0   :  { %vm209_vm0 = vcmask 392192   ;;  %vm51_vm1 = vcmask 261120   ;;  %v695_v0 = vmov 0.0|0.0   ;;  %vm696_vm4 = vmmov 0   ;;  %s927_s4 = inlined_call_operand.vmem [shape: f32[128,48], index: 4, kind: input, shape index: {}]   ;;  %s928_s2 = inlined_call_operand.vmem [shape: f32[128,32], index: 2, kind: input, shape index: {}]   ;;  %s929_s1 = inlined_call_operand.vmem [shape: f32[8,48], index: 1, kind: input, shape index: {}]   ;;  %s930_s0 = inlined_call_operand.vmem [shape: f32[8,32], index: 0, kind: input, shape index: {}]   ;;  %s931_s5 = inlined_call_operand.vmem [shape: f32[1,128], index: 5, kind: input, shape index: {}]   ;;  %s932_s3 = inlined_call_operand.vmem [shape: f32[1,128], index: 3, kind: input, shape index: {}]   ;;  %s933_s6 = inlined_call_operand.vmem [shape: f32[8,1], index: 6, kind: output, shape index: {}]  }
   0x1   :  { %646 = vmatprep.subr.bf16.mxu1 %v695_v0  ;;  %v186_v1 = vld [vmem:[%s927_s4] sm:$0xff]  ;;  %v187_v2 = vld [vmem:[%s927_s4 + $0x8] sm:$0xff]  ;;  %vm744_vm2 = vmpackc.low %vm209_vm0, %vm209_vm0  ;;  %614 = vmatprep.subr.bf16.mxu0 %v695_v0  ;;  %v697_v8 = vmov 0.0   ;;  %vm181_vm5 = vcmask 7168   ;;  %vm421_vm6 = vcmask 64512  }
   0x2   :  { %v647_v4 = vpack.c.bf16 %v187_v2, %v186_v1  ;;  %v28_v5 = vld [vmem:[%s928_s2] sm:$0xff]  ;;  %v29_v6 = vld [vmem:[%s928_s2 + $0x8] sm:$0xff]  ;;  %vm757_vm3 = vmpackc.low %vm51_vm1, %vm51_vm1  ;;  %606 = vmatprep.mubr.msk.f32.mxu1 %vm696_vm4, %v697_v8  ;;  %571 = vmatprep.mubr.msk.f32.mxu0 %vm696_vm4, %v697_v8  ;;  %183 = vst.msk [vmem:[#allocation4] sm:$0xff] %vm181_vm5, %v697_v8 }
   0x3   :  { %v615_v9 = vpack.c.bf16 %v29_v6, %v28_v5  ;;  %v188_v10 = vld [vmem:[%s927_s4 + $0x10] sm:$0xff]  ;;  %v189_v11 = vld [vmem:[%s927_s4 + $0x18] sm:$0xff]  ;;  %v190_v16 = vld [vmem:[%s927_s4 + $0x20] sm:$0xff]  ;;  %184 = vst.msk [vmem:[#allocation5] sm:$0xff] %vm181_vm5, %v697_v8 }
   0x4   :  { %649 = vmatpush3.bf16.xpose.msk.msra.mxu1 %vm744_vm2, %v647_v4  ;;  %v30_v12 = vld [vmem:[%s928_s2 + $0x10] sm:$0xff]  ;;  %v31_v13 = vld [vmem:[%s928_s2 + $0x18] sm:$0xff]  ;;  %v651_v14 = vpack.c.bf16 %v189_v11, %v188_v10  ;;  %v191_v17 = vld [vmem:[%s927_s4 + $0x28] sm:$0xff]  ;;  %v698_v10 = vmov -inf  }
   0x5   :  { %617 = vmatpush3.bf16.xpose.msk.msra.mxu0 %vm757_vm3, %v615_v9  ;;  %650 = vmatprep.subr.bf16.mxu1 %v695_v0  ;;  %v619_v15 = vpack.c.bf16 %v31_v13, %v30_v12  ;;  %v32_v18 = vld [vmem:[%s928_s2 + $0x20] sm:$0xff]  ;;  %v33_v19 = vld [vmem:[%s928_s2 + $0x28] sm:$0xff]  ;;  %v655_v20 = vpack.c.bf16 %v191_v17, %v190_v16  ;;  %v192_v22 = vld [vmem:[%s927_s4 + $0x30] sm:$0xff]  ;;  %182 = vst.msk [vmem:[#allocation3] sm:$0xff] %vm181_vm5, %v698_v10 }
   0x6   :  { %618 = vmatprep.subr.bf16.mxu0 %v695_v0  ;;  %v623_v21 = vpack.c.bf16 %v33_v19, %v32_v18  ;;  %v193_v23 = vld [vmem:[%s927_s4 + $0x38] sm:$0xff]  ;;  %v34_v24 = vld [vmem:[%s928_s2 + $0x30] sm:$0xff]  ;;  %v194_v28 = vld [vmem:[%s927_s4 + $0x40] sm:$0xff] }
   0x7   :  { %v35_v25 = vld [vmem:[%s928_s2 + $0x38] sm:$0xff]  ;;  %v659_v26 = vpack.c.bf16 %v193_v23, %v192_v22  ;;  %v195_v29 = vld [vmem:[%s927_s4 + $0x48] sm:$0xff]  ;;  %v36_v30 = vld [vmem:[%s928_s2 + $0x40] sm:$0xff] }
   0x8   :  { %v627_v27 = vpack.c.bf16 %v35_v25, %v34_v24  ;;  %v37_v31 = vld [vmem:[%s928_s2 + $0x48] sm:$0xff]  ;;  %v663_v32 = vpack.c.bf16 %v195_v29, %v194_v28  ;;  %v196_v34 = vld [vmem:[%s927_s4 + $0x50] sm:$0xff]  ;;  %v197_v35 = vld [vmem:[%s927_s4 + $0x58] sm:$0xff] }
   0x9   :  { %v631_v33 = vpack.c.bf16 %v37_v31, %v36_v30  ;;  %v38_v36 = vld [vmem:[%s928_s2 + $0x50] sm:$0xff]  ;;  %v39_v37 = vld [vmem:[%s928_s2 + $0x58] sm:$0xff]  ;;  %v667_v38 = vpack.c.bf16 %v197_v35, %v196_v34  ;;  %v198_v40 = vld [vmem:[%s927_s4 + $0x60] sm:$0xff] }
   0xa   :  { %v635_v39 = vpack.c.bf16 %v39_v37, %v38_v36  ;;  %v199_v41 = vld [vmem:[%s927_s4 + $0x68] sm:$0xff]  ;;  %v40_v42 = vld [vmem:[%s928_s2 + $0x60] sm:$0xff]  ;;  %v200_v46 = vld [vmem:[%s927_s4 + $0x70] sm:$0xff] }
   0xb   :  { %v41_v43 = vld [vmem:[%s928_s2 + $0x68] sm:$0xff]  ;;  %v671_v44 = vpack.c.bf16 %v199_v41, %v198_v40  ;;  %v201_v47 = vld [vmem:[%s927_s4 + $0x78] sm:$0xff]  ;;  %v42_v48 = vld [vmem:[%s928_s2 + $0x70] sm:$0xff] }
   0xc   :  { %653 = vmatpush3.bf16.xpose.msk.msra.mxu1 %vm744_vm2, %v651_v14  ;;  %v639_v45 = vpack.c.bf16 %v41_v43, %v40_v42  ;;  %v43_v49 = vld [vmem:[%s928_s2 + $0x78] sm:$0xff]  ;;  %v675_v50 = vpack.c.bf16 %v201_v47, %v200_v46  ;;  %v185_v52 = vld [vmem:[%s929_s1] sm:$0xff]  ;;  %v699_v14 = vmov 0   ;;  %v436_v30 = vld [vmem:[#allocation4] sm:$0xff] }
   0xd   :  { %621 = vmatpush3.bf16.xpose.msk.msra.mxu0 %vm757_vm3, %v619_v15  ;;  %654 = vmatprep.subr.bf16.mxu1 %v695_v0  ;;  %v643_v51 = vpack.c.bf16 %v43_v49, %v42_v48  ;;  %v27_v53 = vld [vmem:[%s930_s0] sm:$0xff]  ;;  %v418_v34 = vld [vmem:[#allocation5] sm:$0xff] }
   0xe   :  { %622 = vmatprep.subr.bf16.mxu0 %v695_v0  ;;  %v485_v54 = vld [vmem:[%s931_s5] ss:$0 sm:$0xff]  ;;  %683 = vset.pattern.permute.xlu1 %v699_v14 }
   0xf   :  { %v467_v55 = vld [vmem:[%s932_s3] ss:$0 sm:$0xff]  ;;  %684 = vset.pattern.permute.xlu0 %v699_v14 }
  0x10   :  { %v428_v15 = vld [vmem:[#allocation3] sm:$0xff] }
  0x14   :  { %657 = vmatpush3.bf16.xpose.msk.msra.mxu1 %vm744_vm2, %v655_v20 }
  0x15   :  { %625 = vmatpush3.bf16.xpose.msk.msra.mxu0 %vm757_vm3, %v623_v21  ;;  %658 = vmatprep.subr.bf16.mxu1 %v695_v0 }
  0x16   :  { %626 = vmatprep.subr.bf16.mxu0 %v695_v0 }
  0x1c   :  { %661 = vmatpush3.bf16.xpose.msk.msra.mxu1 %vm744_vm2, %v659_v26 }
  0x1d   :  { %629 = vmatpush3.bf16.xpose.msk.msra.mxu0 %vm757_vm3, %v627_v27  ;;  %662 = vmatprep.subr.bf16.mxu1 %v695_v0 }
  0x1e   :  { %630 = vmatprep.subr.bf16.mxu0 %v695_v0 }
  0x24   :  { %665 = vmatpush3.bf16.xpose.msk.msra.mxu1 %vm744_vm2, %v663_v32 }
  0x25   :  { %633 = vmatpush3.bf16.xpose.msk.msra.mxu0 %vm757_vm3, %v631_v33  ;;  %666 = vmatprep.subr.bf16.mxu1 %v695_v0 }
  0x26   :  { %634 = vmatprep.subr.bf16.mxu0 %v695_v0 }
  0x2c   :  { %669 = vmatpush3.bf16.xpose.msk.msra.mxu1 %vm744_vm2, %v667_v38 }
  0x2d   :  { %637 = vmatpush3.bf16.xpose.msk.msra.mxu0 %vm757_vm3, %v635_v39  ;;  %670 = vmatprep.subr.bf16.mxu1 %v695_v0 }
  0x2e   :  { %638 = vmatprep.subr.bf16.mxu0 %v695_v0 }
  0x34   :  { %673 = vmatpush3.bf16.xpose.msk.msra.mxu1 %vm744_vm2, %v671_v44 }
  0x35   :  { %641 = vmatpush3.bf16.xpose.msk.msra.mxu0 %vm757_vm3, %v639_v45  ;;  %674 = vmatprep.subr.bf16.mxu1 %v695_v0 }
  0x36   :  { %642 = vmatprep.subr.bf16.mxu0 %v695_v0 }
  0x3c   :  { %677 = vmatpush3.bf16.xpose.msk.msra.mxu1 %vm744_vm2, %v675_v50 }
  0x3d   :  { %645 = vmatpush3.bf16.xpose.msk.msra.mxu0 %vm757_vm3, %v643_v51 }
  0x3e   :  { %609 = vmatprep.subr.mxu0 %v697_v8 }
  0x43   :  { %607 = vmatmul.mubr.msk.f32.vlgmr.msra.gmra.mrb[0].mxu1 %vm209_vm0, %v185_v52 }
  0x44   :  { %572 = vmatmul.mubr.msk.f32.vlgmr.msra.gmra.mrb[0].mxu0 %vm51_vm1, %v27_v53 }
  0x45   :  { %611 = vmatprep.mubr.msk.f32.mxu0 %vm696_vm4, %v697_v8  ;;  %v409_v8 = vlaneseq }
  0x47   :  { %v410_v22 = vshrl.u32 %v409_v8, 7  ;;  %v415_v23 = vand.u32 127, %v409_v8 }
  0x49   :  { %vm419_vm7 = vcmp.eq.s32.totalorder %v410_v22, %v415_v23 }
 0x116   :  { %v327_v56 = vpop.f32.mrb[0].mxu1 }
 0x117   :  { %v328_v57 = vadd.f32 %v485_v54, %v327_v56  ;;  %v608_v58 = vpop.f32.mrb[1].mxu1  ;;  %v169_v59 = vpop.f32.mrb[0].mxu0 }
 0x118   :  { %v170_v60 = vadd.f32 %v467_v55, %v169_v59  ;;  %v573_v61 = vpop.f32.mrb[1].mxu0 }
 0x119   :  { %v331_v62 = vmul.f32 %v328_v57, %v328_v57 }
 0x11a   :  { %v173_v63 = vmul.f32 %v170_v60, %v170_v60 }
 0x11b   :  { %332 = vadd.xlane.f32.xlu0 %v331_v62 }
 0x11f   :  { %174 = vadd.xlane.f32.xlu0 %v173_v63 }
 0x1a8   :  { %v333_v0 = vpop.xlane.xlu0 %332 }
 0x1a9   :  { %v334_v1 = vmax.f32 %v333_v0, 1e-24 }
 0x1ab   :  { %685 = vrsqrt.f32 %v334_v1 }
 0x1ac   :  { %v175_v2 = vpop.xlane.xlu0 %174 }
 0x1ad   :  { %v176_v3 = vmax.f32 %v175_v2, 1e-24 }
 0x1af   :  { %687 = vrsqrt.f32 %v176_v3 }
 0x1b5   :  { %v686_v4 = vpop.eup %685 }
 0x1b6   :  { %v336_v5 = vmul.f32 %v686_v4, %v328_v57 }
 0x1b8   :  { %610 = vmatpush3.xpose.msra.mxu0 %v336_v5 }
 0x1b9   :  { %v688_v6 = vpop.eup %687 }
 0x1ba   :  { %v178_v7 = vmul.f32 14.285714, %v688_v6 }
 0x1bc   :  { %v179_v9 = vmul.f32 %v178_v7, %v170_v60 }
 0x1be   :  { %612 = vmatmul.mubr.f32.vlgmr.msra.gmra.mrb[2].mxu0 %v179_v9 }
 0x291   :  { %v404_v11 = vpop.f32.mrb[2].mxu0 }
 0x292   :  { %v613_v12 = vpop.f32.mrb[3].mxu0  ;;  %v429_v13 = vsel %vm421_vm6, %v404_v11, -inf  ;;  %v420_v26 = vsel %vm419_vm7, %v404_v11, 0.0 }
 0x293   :  { %430 = vmax.xlane.f32.xlu1 %v429_v13  ;;  %v422_v27 = vsel %vm421_vm6, %v420_v26, 0.0 }
 0x320   :  { %v431_v16 = vpop.xlane.xlu1 %430 }
 0x321   :  { %v432_v17 = vmax.f32 %v428_v15, %v431_v16 }
 0x323   :  { %v433_v18 = vsub.f32 %v428_v15, %v432_v17  ;;  %451 = vst.msk [vmem:[#allocation3] sm:$0xff] %vm181_vm5, %v432_v17  ;;  %440 = vperm.xlu1 %683, %v432_v17  }
 0x325   :  { %v434_v28 = vmul.f32 1.442695, %v433_v18 }
 0x32a   :  { %v455_v40 = vld [vmem:[#allocation3] sm:$0xff] }
 0x3a2   :  { %v441_v19 = vpop.permute.xlu1 %440 }
 0x3a3   :  { %v443_v20 = vsub.f32 %v404_v11, %v441_v19 }
 0x3a5   :  { %v444_v21 = vmul.f32 1.442695, %v443_v20 }
 0x3a7   :  { %689 = vpow2.f32 %v444_v21 }
 0x3a8   :  { %691 = vpow2.f32 %v434_v28 }
 0x3b1   :  { %v690_v24 = vpop.eup %689 }
 0x3b2   :  { %v446_v25 = vsel %vm421_vm6, %v690_v24, 0.0  ;;  %v692_v29 = vpop.eup %691 }
 0x3b3   :  { %447 = vadd.xlane.f32.xlu0 %v446_v25  ;;  %v437_v31 = vmul.f32 %v692_v29, %v436_v30 }
 0x3b7   :  { %423 = vadd.xlane.f32.xlu0 %v422_v27 }
 0x440   :  { %v448_v32 = vpop.xlane.xlu0 %447 }
 0x441   :  { %v449_v33 = vadd.f32 %v448_v32, %v437_v31 }
 0x443   :  { %450 = vst.msk [vmem:[#allocation4] sm:$0xff] %vm181_vm5, %v449_v33 }
 0x444   :  { %v424_v35 = vpop.xlane.xlu0 %423 }
 0x445   :  { %v425_v36 = vadd.f32 %v424_v35, %v418_v34 }
 0x447   :  { %427 = vst.msk [vmem:[#allocation5] sm:$0xff] %vm181_vm5, %v425_v36 }
 0x44a   :  { %v456_v37 = vld [vmem:[#allocation4] sm:$0xff] }
 0x44b   :  { %693 = vlog2.f32 %v456_v37 }
 0x44e   :  { %v460_v42 = vld [vmem:[#allocation5] sm:$0xff] }
 0x455   :  { %v694_v38 = vpop.eup %693 }
 0x456   :  { %v458_v39 = vmul.f32 0.6931472, %v694_v38 }
 0x458   :  { %v459_v41 = vadd.f32 %v458_v39, %v455_v40 }
 0x45a   :  { %v461_v43 = vsub.f32 %v459_v41, %v460_v42 }
 0x45c   :  { %462 = vst.msk [vmem:[%s933_s6] sm:$0xff] %vm181_vm5, %v461_v43 }

</bundles_post_ra>
